<compile_context>
chip_gen: v6e
topology: v6e:2x2x1
jax: 0.10.0
libtpu: 0.0.40
codegen_flags: <defaults>
</compile_context>

<pallas_src>
import functools

import jax
import jax.numpy as jnp
from jax.experimental import pallas as pl
from jax.experimental.pallas import tpu as pltpu

LANE = 128
TARGET_ROWS = 1024  # row tile; 3 streams x 2 buffers x 512 KiB ~= 3 MiB VMEM


def _round_up(x, m):
    return ((x + m - 1) // m) * m


def _focal_elementwise(x, t, w, *, alpha, gamma):
    """Per-element weighted focal loss (f32 math)."""
    x = x.astype(jnp.float32)
    t = t.astype(jnp.float32)

    # Numerically stable BCEWithLogitsLoss(weight=w, reduction='none'):
    #   bce = w * ( max(x, 0) - x * t + log(1 + exp(-|x|)) )
    bce = jnp.maximum(x, 0.0) - x * t + jnp.log1p(jnp.exp(-jnp.abs(x)))
    if w is not None:
        bce = w.astype(jnp.float32) * bce

    # at = alpha_vec.gather(0, targets.long()); alpha_vec = [alpha, 1 - alpha]
    at = jnp.where(t > 0.5, jnp.float32(1.0 - alpha), jnp.float32(alpha))

    pt = jnp.exp(-bce)
    one_minus_pt = 1.0 - pt

    # Specialize integer gamma (gamma=2 in practice) -> multiply chain on the
    # VPU instead of pow (exp(g*log(x)) on the single-issue EUP).
    if float(gamma).is_integer() and 0 <= int(gamma) <= 8:
        gi = int(gamma)
        if gi == 0:
            mod = jnp.ones_like(one_minus_pt)
        else:
            mod = one_minus_pt
            for _ in range(gi - 1):
                mod = mod * one_minus_pt
    else:
        mod = one_minus_pt ** jnp.float32(gamma)

    return at * mod * bce


def _tail_mask(f, *, n_valid, block_rows):
    """Zero out padded elements (only used when padding was added)."""
    i = pl.program_id(0)
    row0 = i * block_rows
    sub = jax.lax.broadcasted_iota(jnp.int32, f.shape, 0)
    lane = jax.lax.broadcasted_iota(jnp.int32, f.shape, 1)
    gidx = (row0 + sub) * LANE + lane
    return jnp.where(gidx < n_valid, f, 0.0)


def _partial_sum(f, *, block_rows):
    """(block_rows, 128) -> (8, 128) partial sums (vreg-aligned VALU adds)."""
    return jnp.sum(f.reshape(block_rows // 8, 8, LANE), axis=0)


def _focal_kernel_w(x_ref, t_ref, w_ref, out_ref, *, alpha, gamma,
                    n_valid, block_rows, need_mask):
    f = _focal_elementwise(x_ref[...], t_ref[...], w_ref[...],
                           alpha=alpha, gamma=gamma)
    if need_mask:
        f = _tail_mask(f, n_valid=n_valid, block_rows=block_rows)
    out_ref[...] = _partial_sum(f, block_rows=block_rows)


def _focal_kernel_nw(x_ref, t_ref, out_ref, *, alpha, gamma,
                     n_valid, block_rows, need_mask):
    f = _focal_elementwise(x_ref[...], t_ref[...], None,
                           alpha=alpha, gamma=gamma)
    if need_mask:
        f = _tail_mask(f, n_valid=n_valid, block_rows=block_rows)
    out_ref[...] = _partial_sum(f, block_rows=block_rows)


def weighted_focal_loss(inputs, targets, weights=None, *, alpha=0.25, gamma=2):
    """Pallas TPU implementation of WeightedFocalLoss.forward.

    inputs, targets: arrays of the same total size N (any shape; flattened).
    weights: optional elementwise weight (BCEWithLogitsLoss `weight`).
    Returns a scalar float32 (mean focal loss).
    """
    x = jnp.asarray(inputs).reshape(-1)
    t = jnp.asarray(targets).reshape(-1)
    has_w = weights is not None
    if has_w:
        w = jnp.asarray(weights).reshape(-1)

    n = x.shape[0]
    rows = -(-n // LANE)                       # cdiv(n, LANE)
    block_rows = min(TARGET_ROWS, _round_up(rows, 8))
    rows_padded = _round_up(rows, block_rows)
    n_padded = rows_padded * LANE
    need_mask = n_padded != n
    grid = (rows_padded // block_rows,)

    def to2d(a):
        if n_padded != n:
            a = jnp.pad(a, (0, n_padded - n))
        return a.reshape(rows_padded, LANE)

    operands = [to2d(x), to2d(t)]
    if has_w:
        operands.append(to2d(w))

    tile_spec = pl.BlockSpec((block_rows, LANE), lambda i: (i, 0))
    in_specs = [tile_spec] * len(operands)

    kernel_fn = _focal_kernel_w if has_w else _focal_kernel_nw
    kernel = functools.partial(
        kernel_fn,
        alpha=float(alpha),
        gamma=gamma,
        n_valid=n,
        block_rows=block_rows,
        need_mask=need_mask,
    )

    partials = pl.pallas_call(
        kernel,
        out_shape=jax.ShapeDtypeStruct((grid[0] * 8, LANE), jnp.float32),
        grid_spec=pltpu.PrefetchScalarGridSpec(
            num_scalar_prefetch=0,
            grid=grid,
            in_specs=in_specs,
            out_specs=pl.BlockSpec((8, LANE), lambda i: (i, 0)),
        ),
        compiler_params=pltpu.CompilerParams(
            dimension_semantics=("parallel",),
        ),
    )(*operands)

    # Tiny final cross-lane reduce + mean in plain JAX.
    return jnp.sum(partials) / jnp.float32(n)


def _reference(inputs, targets, weights=None, alpha=0.25, gamma=2):
    """Plain-JAX reference mirroring the PyTorch module."""
    x = jnp.asarray(inputs, jnp.float32)
    t = jnp.asarray(targets, jnp.float32)
    bce = jnp.maximum(x, 0.0) - x * t + jnp.log1p(jnp.exp(-jnp.abs(x)))
    if weights is not None:
        bce = jnp.asarray(weights, jnp.float32) * bce
    at = jnp.where(t > 0.5, 1.0 - alpha, alpha)
    pt = jnp.exp(-bce)
    return jnp.mean(at * (1.0 - pt) ** gamma * bce)


if __name__ == "__main__":
    key = jax.random.PRNGKey(0)
    k1, k2, k3 = jax.random.split(key, 3)

    N = 2048  # 1-D binary-classification logits / targets
    logits = jax.random.normal(k1, (N,), dtype=jnp.float32) * 2.0
    targets = (jax.random.uniform(k2, (N,)) > 0.7).astype(jnp.float32)
    weights = jax.random.uniform(k3, (N,), minval=0.5, maxval=1.5).astype(jnp.float32)

    # Weighted path.
    out_w = jax.block_until_ready(
        weighted_focal_loss(logits, targets, weights, alpha=0.25, gamma=2))
    ref_w = _reference(logits, targets, weights, alpha=0.25, gamma=2)
    assert jnp.allclose(out_w, ref_w, rtol=1e-5, atol=1e-6), (out_w, ref_w)

    # No-weights fast path + non-128-multiple N (exercises the tail mask).
    M = 2000
    out_nw = jax.block_until_ready(
        weighted_focal_loss(logits[:M], targets[:M], alpha=0.25, gamma=2))
    ref_nw = _reference(logits[:M], targets[:M], alpha=0.25, gamma=2)
    assert jnp.allclose(out_nw, ref_nw, rtol=1e-5, atol=1e-6), (out_nw, ref_nw)

    print("KERNEL_OK")
</pallas_src>

<mosaic_0001>
module attributes {stable_mosaic.version = 11 : i64} {
  func.func @_focal_kernel_w(%arg0: i32, %arg1: memref<16x128xf32, #tpu.memory_space<vmem>>, %arg2: memref<16x128xf32, #tpu.memory_space<vmem>>, %arg3: memref<16x128xf32, #tpu.memory_space<vmem>>, %arg4: memref<8x128xf32, #tpu.memory_space<vmem>>) attributes {dimension_semantics = [#tpu.dimension_semantics<parallel>], iteration_bounds = array<i64: 1>, scalar_prefetch = 0 : i64, scratch_operands = 0 : i64, tpu.core_type = #tpu.core_type<tc>, window_params = [{transform_indices = @transform_0, window_bounds = array<i64: 16, 128>}, {transform_indices = @transform_1, window_bounds = array<i64: 16, 128>}, {transform_indices = @transform_2, window_bounds = array<i64: 16, 128>}, {transform_indices = @transform_3, window_bounds = array<i64: 8, 128>}]} {
    %c0 = arith.constant 0 : index
    %c0_0 = arith.constant 0 : index
    %0 = vector.load %arg1[%c0, %c0_0] : memref<16x128xf32, #tpu.memory_space<vmem>>, vector<16x128xf32>
    %c0_1 = arith.constant 0 : index
    %c0_2 = arith.constant 0 : index
    %1 = vector.load %arg2[%c0_1, %c0_2] : memref<16x128xf32, #tpu.memory_space<vmem>>, vector<16x128xf32>
    %c0_3 = arith.constant 0 : index
    %c0_4 = arith.constant 0 : index
    %2 = vector.load %arg3[%c0_3, %c0_4] : memref<16x128xf32, #tpu.memory_space<vmem>>, vector<16x128xf32>
    %cst = arith.constant 0.000000e+00 : f32
    %3 = vector.broadcast %cst : f32 to vector<16x128xf32>
    %4 = arith.maximumf %0, %3 : vector<16x128xf32>
    %5 = arith.mulf %0, %1 : vector<16x128xf32>
    %6 = arith.subf %4, %5 : vector<16x128xf32>
    %7 = math.absf %0 : vector<16x128xf32>
    %cst_5 = arith.constant 0.000000e+00 : f32
    %8 = vector.broadcast %cst_5 : f32 to vector<16x128xf32>
    %9 = arith.subf %8, %7 : vector<16x128xf32>
    %10 = math.exp %9 : vector<16x128xf32>
    %11 = math.log1p %10 : vector<16x128xf32>
    %12 = arith.addf %6, %11 : vector<16x128xf32>
    %13 = arith.mulf %2, %12 : vector<16x128xf32>
    %cst_6 = arith.constant 5.000000e-01 : f32
    %14 = vector.broadcast %cst_6 : f32 to vector<16x128xf32>
    %15 = arith.cmpf ogt, %1, %14 : vector<16x128xf32>
    %cst_7 = arith.constant 7.500000e-01 : f32
    %cst_8 = arith.constant 2.500000e-01 : f32
    %16 = vector.broadcast %cst_7 : f32 to vector<16x128xf32>
    %17 = vector.broadcast %cst_8 : f32 to vector<16x128xf32>
    %18 = arith.select %15, %16, %17 : vector<16x128xi1>, vector<16x128xf32>
    %cst_9 = arith.constant 0.000000e+00 : f32
    %19 = vector.broadcast %cst_9 : f32 to vector<16x128xf32>
    %20 = arith.subf %19, %13 : vector<16x128xf32>
    %21 = math.exp %20 : vector<16x128xf32>
    %cst_10 = arith.constant 1.000000e+00 : f32
    %22 = vector.broadcast %cst_10 : f32 to vector<16x128xf32>
    %23 = arith.subf %22, %21 : vector<16x128xf32>
    %24 = arith.mulf %23, %23 : vector<16x128xf32>
    %25 = arith.mulf %18, %24 : vector<16x128xf32>
    %26 = arith.mulf %25, %13 : vector<16x128xf32>
    %27 = vector.shape_cast %26 : vector<16x128xf32> to vector<2x8x128xf32>
    %cst_11 = arith.constant dense<0.000000e+00> : vector<8x128xf32>
    %28 = vector.multi_reduction <add>, %27, %cst_11 [0] : vector<2x8x128xf32> to vector<8x128xf32>
    %c0_12 = arith.constant 0 : index
    %c0_13 = arith.constant 0 : index
    %29 = vector.load %arg4[%c0_12, %c0_13] : memref<8x128xf32, #tpu.memory_space<vmem>>, vector<8x128xf32>
    tpu.vector_store %arg4[%c0_12, %c0_13], %28 {strides = array<i32>} : memref<8x128xf32, #tpu.memory_space<vmem>>, vector<8x128xf32>,
    return
  }
  func.func @transform_0(%arg0: i32) -> (i32, i32) {
    %c0_i32 = arith.constant 0 : i32
    %c0_i32_0 = arith.constant 0 : i32
    return %arg0, %c0_i32 : i32, i32
  }
  func.func @transform_1(%arg0: i32) -> (i32, i32) {
    %c0_i32 = arith.constant 0 : i32
    %c0_i32_0 = arith.constant 0 : i32
    return %arg0, %c0_i32 : i32, i32
  }
  func.func @transform_2(%arg0: i32) -> (i32, i32) {
    %c0_i32 = arith.constant 0 : i32
    %c0_i32_0 = arith.constant 0 : i32
    return %arg0, %c0_i32 : i32, i32
  }
  func.func @transform_3(%arg0: i32) -> (i32, i32) {
    %c0_i32 = arith.constant 0 : i32
    %c0_i32_0 = arith.constant 0 : i32
    return %arg0, %c0_i32 : i32, i32
  }
}

</mosaic_0001>

<bundles_post_ra>
// kernel: tpu_custom_call.1
= control target key start
LH: loop header
LB: loop body
LE: loop exit
PB: predicated region body
PF: predicated region fallthrough
CT: control target
= control target key end

     0   :  { %8 = vsyncpa [#allocation3], 0  ;;  %s278_s0 = inlined_call_operand.hbm [shape: f32[16,128], index: 0, kind: input, shape index: {}]   ;;  %s279_s1 = inlined_call_operand.hbm [shape: f32[16,128], index: 1, kind: input, shape index: {}]   ;;  %s280_s2 = inlined_call_operand.hbm [shape: f32[16,128], index: 2, kind: input, shape index: {}]   ;;  %s281_s3 = inlined_call_operand.hbm [shape: f32[8,128], index: 3, kind: output, shape index: {}]  }
   0x1   :  { %9 = vsyncpa [#allocation6], 0 }
   0x2   :  { %10 = vsyncpa [#allocation4], 0  ;;  %s239_s12 = smov [#allocation5]   ;;  %s240_s14 = smov [#allocation2]  }
   0x3   :  { %s28_s13 = sshll.u32 %s239_s12, 4  ;;  %s16_s15 = sshll.u32 %s240_s14, 4  ;;  %s29_s13 = int_to_ptr.vmem [resolvable:$true] %s28_s13  ;;  %s17_s15 = int_to_ptr.vmem [resolvable:$true] %s16_s15 }
   0x4   :  { %s161_s16 = scalar_lea.vmem %s29_s13, 256  ;;  %p166_p1 = scmp.lt.s32.totalorder %s29_s13, %s29_s13 }
   0x5   :  { %p162_p0 = scmp.ne.s32.totalorder %s29_s13, %s161_s16  ;;  %p167_p2 = scmp.lt.s32.totalorder %s161_s16, %s161_s16 }
   0x7   :  { %p168_p3 = por %p167_p2, %p166_p1 }
   0x9   :  { %p169_p4 = pnand %p168_p3, %p162_p0 }
   0xb   :  { %172 = shalt.err (!%p169_p4)
}
   0xc   :  { %s241_s17 = smov 128   ;;  %s242_s18 = smov 8  }
   0xd   :  { %34 = dma.hbm_to_vmem [thread:$0]  %s279_s1, 256, %s29_s13, [#allocation6], %s241_s17, %s241_s17, %s242_s18  }
   0xe   :  { %s181_s21 = scalar_lea.vmem %s17_s15, 256  ;;  %p186_p6 = scmp.lt.s32.totalorder %s17_s15, %s17_s15 }
   0xf   :  { %p182_p5 = scmp.ne.s32.totalorder %s17_s15, %s181_s21  ;;  %p187_p7 = scmp.lt.s32.totalorder %s181_s21, %s181_s21 }
  0x11   :  { %p188_p8 = por %p187_p7, %p186_p6 }
  0x13   :  { %p189_p9 = pnand %p188_p8, %p182_p5 }
  0x15   :  { %192 = shalt.err (!%p189_p9)
}
  0x16   :  { %22 = dma.hbm_to_vmem [thread:$0]  %s278_s0, 256, %s17_s15, [#allocation3], %s241_s17, %s241_s17, %s242_s18  }
  0x17   :  { %s243_s24 = smov [#allocation7]  }
  0x18   :  { %s40_s25 = sshll.u32 %s243_s24, 4  ;;  %s41_s25 = int_to_ptr.vmem [resolvable:$true] %s40_s25 }
  0x19   :  { %s201_s26 = scalar_lea.vmem %s41_s25, 256  ;;  %p206_p11 = scmp.lt.s32.totalorder %s41_s25, %s41_s25 }
  0x1a   :  { %p202_p10 = scmp.ne.s32.totalorder %s41_s25, %s201_s26  ;;  %p207_p12 = scmp.lt.s32.totalorder %s201_s26, %s201_s26 }
  0x1c   :  { %p208_p13 = por %p207_p12, %p206_p11 }
  0x1e   :  { %p209_p0 = pnand %p208_p13, %p202_p10 }
  0x20   :  { %212 = shalt.err (!%p209_p0)
}
  0x21   :  { %46 = dma.hbm_to_vmem [thread:$0]  %s280_s2, 256, %s41_s25, [#allocation6], %s241_s17, %s241_s17, %s242_s18  }
  0x22   :  { %233 = dma.done.wait [#allocation3], 256  }
  0x23   :  { %234 = vsyncadd [#allocation3], 4294967040 }
  0x24   :  { %235 = dma.done.wait [#allocation6], 512  }
  0x25   :  { %236 = vsyncadd [#allocation6], 4294966784  ;;  %v56_v0 = vld [vmem:[#allocation2] sm:$0xff]  ;;  %v57_v1 = vld [vmem:[#allocation2 + $0x8] sm:$0xff]  ;;  %v244_v47 = vmov 0.25   ;;  %s245_s0 = smov [#allocation8]  }
  0x26   :  { %v68_v2 = vand.u32 2147483647, %v56_v0  ;;  %v69_v3 = vand.u32 2147483647, %v57_v1  ;;  %v58_v14 = vld [vmem:[#allocation5] sm:$0xff]  ;;  %v59_v15 = vld [vmem:[#allocation5 + $0x8] sm:$0xff] }
  0x27   :  { %v62_v17 = vmax.f32 %v56_v0, 0.0  ;;  %v64_v18 = vmul.f32 %v58_v14, %v56_v0  ;;  %v63_v21 = vmax.f32 %v57_v1, 0.0  ;;  %v65_v22 = vmul.f32 %v59_v15, %v57_v1  ;;  %v60_v32 = vld [vmem:[#allocation7] sm:$0xff]  ;;  %v61_v34 = vld [vmem:[#allocation7 + $0x8] sm:$0xff]  ;;  %s124_s2 = sshll.u32 %s245_s0, 4  ;;  %s125_s2 = int_to_ptr.vmem [resolvable:$true] %s124_s2 }
  0x28   :  { %v70_v4 = vsub.f32 0.0, %v68_v2  ;;  %v71_v5 = vsub.f32 0.0, %v69_v3  ;;  %vm98_vm2 = vcmp.gt.f32.partialorder %v58_v14, 0.5  ;;  %vm99_vm3 = vcmp.gt.f32.partialorder %v59_v15, 0.5  ;;  %s213_s28 = scalar_lea.vmem %s125_s2, 128  ;;  %p218_p2 = scmp.lt.s32.totalorder %s125_s2, %s125_s2 }
  0x29   :  { %v66_v26 = vsub.f32 %v62_v17, %v64_v18  ;;  %v67_v29 = vsub.f32 %v63_v21, %v65_v22  ;;  %v100_v48 = vsel %vm98_vm2, 0.75, %v244_v47  ;;  %v101_v50 = vsel %vm99_vm3, 0.75, %v244_v47  ;;  %p214_p1 = scmp.ne.s32.totalorder %s125_s2, %s213_s28  ;;  %p219_p3 = scmp.lt.s32.totalorder %s213_s28, %s213_s28 }
  0x2a   :  { %v72_v6 = vmul.f32 1.442695, %v70_v4  ;;  %v74_v7 = vmul.f32 1.442695, %v71_v5 }
  0x2b   :  { %p220_p4 = por %p219_p3, %p218_p2 }
  0x2c   :  { %141 = vpow2.f32 %v72_v6 }
  0x2d   :  { %143 = vpow2.f32 %v74_v7  ;;  %p221_p5 = pnand %p220_p4, %p214_p1 }
  0x39   :  { %v142_v8 = vpop.eup %141 }
  0x3a   :  { %v144_v9 = vpop.eup %143  ;;  %v76_v10 = vadd.f32 1.0, %v142_v8  ;;  %v79_v12 = vmul.f32 -0.5, %v142_v8  ;;  %v82_v19 = vand.u32 2147483647, %v142_v8 }
  0x3b   :  { %v85_v11 = vadd.f32 1.0, %v144_v9  ;;  %v88_v13 = vmul.f32 -0.5, %v144_v9  ;;  %v91_v23 = vand.u32 2147483647, %v144_v9 }
  0x3c   :  { %145 = vlog2.f32 %v76_v10  ;;  %v80_v16 = vadd.f32 1.0, %v79_v12  ;;  %vm83_vm0 = vcmp.lt.f32.partialorder %v82_v19, 0.0004427343 }
  0x3d   :  { %147 = vlog2.f32 %v85_v11  ;;  %v89_v20 = vadd.f32 1.0, %v88_v13  ;;  %vm92_vm1 = vcmp.lt.f32.partialorder %v91_v23, 0.0004427343 }
  0x3e   :  { %v81_v24 = vmul.f32 %v142_v8, %v80_v16 }
  0x3f   :  { %v90_v27 = vmul.f32 %v144_v9, %v89_v20 }
  0x49   :  { %v146_v25 = vpop.eup %145 }
  0x4a   :  { %v148_v28 = vpop.eup %147  ;;  %v78_v30 = vmul.f32 0.6931472, %v146_v25 }
  0x4b   :  { %v87_v31 = vmul.f32 0.6931472, %v148_v28 }
  0x4c   :  { %v84_v33 = vsel %vm83_vm0, %v81_v24, %v78_v30 }
  0x4d   :  { %v93_v35 = vsel %vm92_vm1, %v90_v27, %v87_v31  ;;  %v94_v36 = vadd.f32 %v84_v33, %v66_v26 }
  0x4e   :  { %v95_v37 = vadd.f32 %v93_v35, %v67_v29 }
  0x4f   :  { %v96_v38 = vmul.f32 %v94_v36, %v60_v32 }
  0x50   :  { %v97_v39 = vmul.f32 %v95_v37, %v61_v34 }
  0x51   :  { %v102_v40 = vsub.f32 0.0, %v96_v38 }
  0x52   :  { %v103_v41 = vsub.f32 0.0, %v97_v39 }
  0x53   :  { %v104_v42 = vmul.f32 1.442695, %v102_v40 }
  0x54   :  { %v106_v43 = vmul.f32 1.442695, %v103_v41 }
  0x55   :  { %149 = vpow2.f32 %v104_v42 }
  0x56   :  { %151 = vpow2.f32 %v106_v43 }
  0x62   :  { %v150_v44 = vpop.eup %149 }
  0x63   :  { %v152_v45 = vpop.eup %151  ;;  %v108_v46 = vsub.f32 1.0, %v150_v44 }
  0x64   :  { %v109_v49 = vsub.f32 1.0, %v152_v45 }
  0x65   :  { %v110_v51 = vmul.f32 %v108_v46, %v108_v46 }
  0x66   :  { %v111_v52 = vmul.f32 %v109_v49, %v109_v49 }
  0x67   :  { %v112_v53 = vmul.f32 %v110_v51, %v100_v48 }
  0x68   :  { %v113_v54 = vmul.f32 %v111_v52, %v101_v50 }
  0x69   :  { %v114_v55 = vmul.f32 %v112_v53, %v96_v38 }
  0x6a   :  { %v115_v56 = vmul.f32 %v113_v54, %v97_v39 }
  0x6c   :  { %v116_v57 = vadd.f32 %v115_v56, %v114_v55 }
  0x6e   :  { %117 = vst [vmem:[#allocation8] sm:$0xff] %v116_v57 }
  0x6f   :  { %224 = shalt.err (!%p221_p5)
}
  0x70   :  { %127 = dma.vmem_to_hbm [thread:$0]  %s125_s2, 128, %s281_s3, [#allocation4]  }
  0x71   :  { %237 = dma.done.wait [#allocation4], 128  }
  0x72   :  { %238 = vsyncadd [#allocation4], 4294967168 }
  0x73   :  { %131 = vsyncpa [#allocation3], 1 }
  0x74   :  { %132 = vsyncpa [#allocation6], 1 }
  0x75   :  { %133 = vsyncpa [#allocation4], 1 }

</bundles_post_ra>
